<compile_context>
chip_gen: v7x
topology: tpu7x:2x2x1
jax: 0.10.0
libtpu: 0.0.40
codegen_flags: <defaults>
</compile_context>

<pallas_src>
import jax
import jax.numpy as jnp
from jax.experimental import pallas as pl
from jax.experimental.pallas import tpu as pltpu


def _round_up(v, m):
    return -(-v // m) * m


def _vmem_capacity_bytes():
    """Physical VMEM per core (generation aware), with a safe fallback."""
    try:
        info = pltpu.get_tpu_info()
        cap = int(getattr(info, "vmem_capacity_bytes", 0))
        if cap > 0:
            return cap
    except Exception:
        pass
    return 64 << 20          # v7x is the smallest (64 MiB) -> safe everywhere


def _budgets():
    cap = _vmem_capacity_bytes()
    # Pipelined working-set budget: ~25 MiB on v7x (64 MiB VMEM),
    # ~48 MiB on v5e/v6e (128 MiB VMEM).
    ws_budget = min(int(cap * 0.4), 48 << 20)
    vmem_limit = min(int(cap * 0.75), 96 << 20)
    return ws_budget, vmem_limit


def _working_set_bytes(P, tile):
    """Per-step double-buffered VMEM footprint (all f32), every buffer counted."""
    x_in = 2 * P * tile * 4
    out = 2 * P * tile * 4
    aff = 2 * 4 * tile * 4
    w = 2 * P * P * 4
    bias = 2 * P * 4
    return x_in + out + aff + w + bias


def _cost(B, P, F):
    flops = 2 * B * F * P * P + 6 * B * P * F
    bytes_accessed = 2 * B * P * F * 4 + P * P * 4 + 4 * F * 4 + P * 4
    return pl.CostEstimate(flops=flops, transcendentals=0,
                           bytes_accessed=bytes_accessed)


def _comm_kernel(x_ref, w_ref, bias_ref, aff_ref, o_ref):
    """One (P, T) lane tile: aff1 -> token-mix matmul -> bias -> aff2 -> +res."""
    x = x_ref[...]                                 # (P, T)
    aff = aff_ref[...]                             # (4, T) packed affines
    xa = aff[0:1, :] * x + aff[1:2, :]             # aff1; also the residual
    # Token-mixing matmul on the MXU, f32 operands + f32 accumulation.
    y = jnp.dot(w_ref[...], xa, preferred_element_type=jnp.float32)
    y = y + bias_ref[...]                          # (P, 1) broadcast over lanes
    y = aff[2:3, :] * y + aff[3:4, :]              # aff2
    o_ref[...] = (y + xa).astype(o_ref.dtype)      # residual add in f32


def _fast_path(x, w, bias2d, aff):
    """F % 128 == 0: tile the feature axis of the original (B, P, F) layout."""
    B, P, F = x.shape
    ws_budget, vmem_limit = _budgets()

    # Largest lane tile that is a multiple of 128, divides F, and fits VMEM.
    tf = 128
    for cand in sorted({d for d in range(128, F + 1, 128) if F % d == 0},
                       reverse=True):
        if _working_set_bytes(P, cand) <= ws_budget:
            tf = cand
            break

    x_spec = pl.BlockSpec((pl.Squeezed(), P, tf), lambda b, j: (b, 0, j))

    return pl.pallas_call(
        _comm_kernel,
        out_shape=jax.ShapeDtypeStruct((B, P, F), x.dtype),
        grid_spec=pltpu.PrefetchScalarGridSpec(
            num_scalar_prefetch=0,
            grid=(B, F // tf),
            in_specs=[
                x_spec,                                      # x tile (P, tf)
                pl.BlockSpec((P, P), lambda b, j: (0, 0)),   # W (resident)
                pl.BlockSpec((P, 1), lambda b, j: (0, 0)),   # bias
                pl.BlockSpec((4, tf), lambda b, j: (0, j)),  # packed affines
            ],
            out_specs=x_spec,
        ),
        compiler_params=pltpu.CompilerParams(
            dimension_semantics=("parallel", "parallel"),
            vmem_limit_bytes=vmem_limit),
        cost_estimate=_cost(B, P, F),
    )(x, w, bias2d, aff)


def _slab_path(x, w, bias2d, aff):
    """Lane-sparse F fallback: present a lane-dense (P, B*F) slab to the kernel."""
    B, P, F = x.shape
    N = B * F
    ws_budget, vmem_limit = _budgets()

    x_slab = jnp.transpose(x, (1, 0, 2)).reshape(P, N)
    aff_slab = jnp.tile(aff, (1, B))               # column n = b*F + f -> aff[:, f]

    # Lane tile: prefer pipelined multiples of 128; tiny N -> one full block.
    tn = None
    for cand in (8192, 4096, 2048, 1024, 512, 256, 128):
        if cand <= N and _working_set_bytes(P, cand) <= ws_budget:
            tn = cand
            break
    if tn is None:
        tn, n_pad = N, N                           # single full-extent block
    else:
        n_pad = _round_up(N, tn)

    if n_pad != N:
        x_slab = jnp.pad(x_slab, ((0, 0), (0, n_pad - N)))
        aff_slab = jnp.pad(aff_slab, ((0, 0), (0, n_pad - N)))

    out_slab = pl.pallas_call(
        _comm_kernel,
        out_shape=jax.ShapeDtypeStruct((P, n_pad), x.dtype),
        grid_spec=pltpu.PrefetchScalarGridSpec(
            num_scalar_prefetch=0,
            grid=(n_pad // tn,),
            in_specs=[
                pl.BlockSpec((P, tn), lambda j: (0, j)),   # x slab tile
                pl.BlockSpec((P, P), lambda j: (0, 0)),    # W (resident)
                pl.BlockSpec((P, 1), lambda j: (0, 0)),    # bias
                pl.BlockSpec((4, tn), lambda j: (0, j)),   # packed affines
            ],
            out_specs=pl.BlockSpec((P, tn), lambda j: (0, j)),
        ),
        compiler_params=pltpu.CompilerParams(
            dimension_semantics=("parallel",),
            vmem_limit_bytes=vmem_limit),
        cost_estimate=_cost(B, P, F),
    )(x_slab, w, bias2d, aff_slab)

    out = out_slab[:, :N].reshape(P, B, F)
    return jnp.transpose(out, (1, 0, 2))


def communication_layer(x, w, bias, alpha1, beta1, alpha2, beta2):
    """x: (B, P, F). w: (P, P) fc1.weight. bias: (P,). alphas/betas: (F,)."""
    _, P, F = x.shape
    f32 = jnp.float32
    w = w.astype(f32)
    bias2d = bias.astype(f32).reshape(P, 1)
    aff = jnp.stack([alpha1, beta1, alpha2, beta2]).astype(f32)   # (4, F)

    if F % 128 == 0:
        return _fast_path(x, w, bias2d, aff)
    return _slab_path(x, w, bias2d, aff)


def _reference(x, w, bias, alpha1, beta1, alpha2, beta2):
    xa = alpha1[None, None, :] * x + beta1[None, None, :]
    y = jnp.einsum("pq,bqf->bpf", w, xa) + bias[None, :, None]
    y = alpha2[None, None, :] * y + beta2[None, None, :]
    return y + xa


if __name__ == "__main__":
    def run_case(B, P, F):
        key = jax.random.PRNGKey(0)
        kx, kw, kb, ka1, kb1, ka2, kb2 = jax.random.split(key, 7)
        x = jax.random.normal(kx, (B, P, F), dtype=jnp.float32)
        # Deterministic synthetic parameters (fc1 Linear(P, P), affines over F).
        w = jax.random.normal(kw, (P, P), dtype=jnp.float32) * 0.1
        bias = jax.random.normal(kb, (P,), dtype=jnp.float32) * 0.1
        alpha1 = 1.0 + 0.05 * jax.random.normal(ka1, (F,), dtype=jnp.float32)
        beta1 = 0.05 * jax.random.normal(kb1, (F,), dtype=jnp.float32)
        alpha2 = 1.0 + 0.05 * jax.random.normal(ka2, (F,), dtype=jnp.float32)
        beta2 = 0.05 * jax.random.normal(kb2, (F,), dtype=jnp.float32)

        out = communication_layer(x, w, bias, alpha1, beta1, alpha2, beta2)
        out = jax.block_until_ready(out)
        ref = _reference(x, w, bias, alpha1, beta1, alpha2, beta2)
        assert out.shape == (B, P, F)
        # f32 matmul on the MXU -> tight tolerance (was 2e-2 with bf16 operands).
        assert jnp.allclose(out, ref, atol=1e-3, rtol=1e-3), (
            f"mismatch vs reference at B={B} P={P} F={F}")

    run_case(B=2, P=8, F=32)     # lane-sparse fallback (slab layout)
    run_case(B=2, P=8, F=128)    # lane-dense fast path (original layout)
    print("KERNEL_OK")
</pallas_src>

<mosaic_0001>
module attributes {stable_mosaic.version = 11 : i64} {
  func.func @_comm_kernel(%arg0: i32, %arg1: memref<8x64xf32, #tpu.memory_space<vmem>>, %arg2: memref<8x8xf32, #tpu.memory_space<vmem>>, %arg3: memref<8x1xf32, #tpu.memory_space<vmem>>, %arg4: memref<4x64xf32, #tpu.memory_space<vmem>>, %arg5: memref<8x64xf32, #tpu.memory_space<vmem>>) attributes {dimension_semantics = [#tpu.dimension_semantics<parallel>], iteration_bounds = array<i64: 1>, scalar_prefetch = 0 : i64, scratch_operands = 0 : i64, tpu.core_type = #tpu.core_type<tc>, window_params = [{transform_indices = @transform_0, window_bounds = array<i64: 8, 64>}, {pipeline_mode = #tpu.pipeline_mode<synchronous>, transform_indices = @transform_1, window_bounds = array<i64: 8, 8>}, {pipeline_mode = #tpu.pipeline_mode<synchronous>, transform_indices = @transform_2, window_bounds = array<i64: 8, 1>}, {transform_indices = @transform_3, window_bounds = array<i64: 4, 64>}, {transform_indices = @transform_4, window_bounds = array<i64: 8, 64>}]} {
    %c0 = arith.constant 0 : index
    %c0_0 = arith.constant 0 : index
    %0 = vector.load %arg1[%c0, %c0_0] : memref<8x64xf32, #tpu.memory_space<vmem>>, vector<8x64xf32>
    %c0_1 = arith.constant 0 : index
    %c0_2 = arith.constant 0 : index
    %1 = vector.load %arg4[%c0_1, %c0_2] : memref<4x64xf32, #tpu.memory_space<vmem>>, vector<4x64xf32>
    %2 = vector.extract_strided_slice %1 {offsets = [0, 0], sizes = [1, 64], strides = [1, 1]} : vector<4x64xf32> to vector<1x64xf32>
    %3 = vector.broadcast %2 : vector<1x64xf32> to vector<8x64xf32>
    %4 = arith.mulf %3, %0 : vector<8x64xf32>
    %5 = vector.extract_strided_slice %1 {offsets = [1, 0], sizes = [1, 64], strides = [1, 1]} : vector<4x64xf32> to vector<1x64xf32>
    %6 = vector.broadcast %5 : vector<1x64xf32> to vector<8x64xf32>
    %7 = arith.addf %4, %6 : vector<8x64xf32>
    %c0_3 = arith.constant 0 : index
    %c0_4 = arith.constant 0 : index
    %8 = vector.load %arg2[%c0_3, %c0_4] : memref<8x8xf32, #tpu.memory_space<vmem>>, vector<8x8xf32>
    %cst = arith.constant dense<0.000000e+00> : vector<8x64xf32>
    %9 = tpu.matmul %8, %7, %cst {dimension_numbers = #tpu.dot_dimension_numbers<[1], [0], [0], [1], [0, 0, 1, 1], [], []>} : vector<8x8xf32>, vector<8x64xf32>, vector<8x64xf32> -> vector<8x64xf32>
    %c0_5 = arith.constant 0 : index
    %c0_6 = arith.constant 0 : index
    %10 = vector.load %arg3[%c0_5, %c0_6] : memref<8x1xf32, #tpu.memory_space<vmem>>, vector<8x1xf32>
    %11 = vector.broadcast %10 : vector<8x1xf32> to vector<8x64xf32>
    %12 = arith.addf %9, %11 : vector<8x64xf32>
    %13 = vector.extract_strided_slice %1 {offsets = [2, 0], sizes = [1, 64], strides = [1, 1]} : vector<4x64xf32> to vector<1x64xf32>
    %14 = vector.broadcast %13 : vector<1x64xf32> to vector<8x64xf32>
    %15 = arith.mulf %14, %12 : vector<8x64xf32>
    %16 = vector.extract_strided_slice %1 {offsets = [3, 0], sizes = [1, 64], strides = [1, 1]} : vector<4x64xf32> to vector<1x64xf32>
    %17 = vector.broadcast %16 : vector<1x64xf32> to vector<8x64xf32>
    %18 = arith.addf %15, %17 : vector<8x64xf32>
    %19 = arith.addf %18, %7 : vector<8x64xf32>
    %c0_7 = arith.constant 0 : index
    %c0_8 = arith.constant 0 : index
    %20 = vector.load %arg5[%c0_7, %c0_8] : memref<8x64xf32, #tpu.memory_space<vmem>>, vector<8x64xf32>
    tpu.vector_store %arg5[%c0_7, %c0_8], %19 {strides = array<i32>} : memref<8x64xf32, #tpu.memory_space<vmem>>, vector<8x64xf32>,
    return
  }
  func.func @transform_0(%arg0: i32) -> (i32, i32) {
    %c0_i32 = arith.constant 0 : i32
    %c0_i32_0 = arith.constant 0 : i32
    return %c0_i32, %arg0 : i32, i32
  }
  func.func @transform_1(%arg0: i32) -> (i32, i32) {
    %c0_i32 = arith.constant 0 : i32
    %c0_i32_0 = arith.constant 0 : i32
    %c0_i32_1 = arith.constant 0 : i32
    return %c0_i32, %c0_i32_0 : i32, i32
  }
  func.func @transform_2(%arg0: i32) -> (i32, i32) {
    %c0_i32 = arith.constant 0 : i32
    %c0_i32_0 = arith.constant 0 : i32
    %c0_i32_1 = arith.constant 0 : i32
    return %c0_i32, %c0_i32_0 : i32, i32
  }
  func.func @transform_3(%arg0: i32) -> (i32, i32) {
    %c0_i32 = arith.constant 0 : i32
    %c0_i32_0 = arith.constant 0 : i32
    return %c0_i32, %arg0 : i32, i32
  }
  func.func @transform_4(%arg0: i32) -> (i32, i32) {
    %c0_i32 = arith.constant 0 : i32
    %c0_i32_0 = arith.constant 0 : i32
    return %c0_i32, %arg0 : i32, i32
  }
}

</mosaic_0001>

<bundles_post_ra>
// kernel: tpu_custom_call.1
= control target key start
LH: loop header
LB: loop body
LE: loop exit
PB: predicated region body
PF: predicated region fallthrough
CT: control target
= control target key end

     0   :  { %9 = vsyncpa [#allocation3], 0  ;;  %s276_s0 = inlined_call_operand.vmem [shape: f32[8,64], index: 0, kind: input, shape index: {}]   ;;  %s277_s1 = inlined_call_operand.hbm [shape: f32[8,8], index: 1, kind: input, shape index: {}]   ;;  %s278_s2 = inlined_call_operand.vmem [shape: f32[8,1], index: 2, kind: input, shape index: {}]   ;;  %s279_s3 = inlined_call_operand.vmem [shape: f32[4,64], index: 3, kind: input, shape index: {}]   ;;  %s280_s4 = inlined_call_operand.hbm [shape: f32[8,64], index: 4, kind: output, shape index: {}]  }
   0x1   :  { %10 = vsyncpa [#allocation4], 0  ;;  %s213_s15 = smov [#allocation2]   ;;  %s165_s19 = scalar_lea.hbm %s277_s1, 128 }
   0x2   :  { %s19_s16 = sshll.u32 %s213_s15, 4  ;;  %p166_p0 = scmp.ne.s32.totalorder %s277_s1, %s165_s19  ;;  %s20_s16 = int_to_ptr.vmem [resolvable:$true] %s19_s16 }
   0x3   :  { %p169_p1 = scmp.lt.u32.totalorder %s165_s19, %s277_s1 }
   0x5   :  { %p171_p2 = pnand %p169_p1, %p166_p0 }
   0x7   :  { %174 = shalt.err (!%p171_p2)
}
   0x8   :  { %s175_s24 = scalar_lea.vmem %s20_s16, 128  ;;  %p180_p4 = scmp.lt.s32.totalorder %s20_s16, %s20_s16 }
   0x9   :  { %p176_p3 = scmp.ne.s32.totalorder %s20_s16, %s175_s24  ;;  %p181_p5 = scmp.lt.s32.totalorder %s175_s24, %s175_s24 }
   0xb   :  { %p182_p6 = por %p181_p5, %p180_p4 }
   0xd   :  { %p183_p7 = pnand %p182_p6, %p176_p3 }
   0xf   :  { %186 = shalt.err (!%p183_p7)
}
  0x10   :  { %22 = dma.hbm_to_vmem [thread:$0]  %s277_s1, 128, %s20_s16, [#allocation3]  }
  0x11   :  { %209 = dma.done.wait [#allocation3], 128  }
  0x12   :  { %210 = vsyncadd [#allocation3], 4294967168  ;;  %v32_v0 = vlaneseq  ;;  %v214_v1 = vmov 0.0   ;;  %vm215_vm0 = vmmov 0   ;;  %v216_v3 = vmov 0   ;;  %v30_v6 = vld [vmem:[%s276_s0] sm:$0xff] }
  0x13   :  { %154 = vmatprep.subr.mxu0 %v214_v1  ;;  %156 = vmatprep.mubr.msk.f32.mxu0 %vm215_vm0, %v214_v1  ;;  %v31_v7 = vld [vmem:[%s279_s3] sm:$0xf]  ;;  %vm49_vm1 = vcmask 64512   ;;  %s217_s0 = smov [#allocation5]   ;;  %vm134_vm2 = vcmask 523264  }
  0x14   :  { %v33_v2 = vshrl.u32 %v32_v0, 7  ;;  %164 = vset.pattern.permute.xlu0 %v216_v3  ;;  %v43_v10 = vld [vmem:[%s278_s2] sm:$0xff]  ;;  %s142_s3 = sshll.u32 %s217_s0, 4  ;;  %s143_s3 = int_to_ptr.vmem [resolvable:$true] %s142_s3 }
  0x15   :  { %46 = vperm.xlu0 %164, %v43_v10   ;;  %v42_v13 = vld [vmem:[#allocation2] sm:$0xff]  ;;  %s187_s2 = scalar_lea.vmem %s143_s3, 128  ;;  %p192_p9 = scmp.lt.s32.totalorder %s143_s3, %s143_s3 }
  0x16   :  { %v34_v4 = vsub.s32 0, %v33_v2  ;;  %v39_v5 = vsub.s32 1, %v33_v2  ;;  %v125_v14 = vsub.s32 2, %v33_v2  ;;  %v130_v15 = vsub.s32 3, %v33_v2  ;;  %p188_p8 = scmp.ne.s32.totalorder %s143_s3, %s187_s2  ;;  %p193_p10 = scmp.lt.s32.totalorder %s187_s2, %s187_s2 }
  0x18   :  { %v35_v8 = vrot.slane %v31_v7, %v34_v4  ;;  %v40_v9 = vrot.slane %v31_v7, %v39_v5  ;;  %v126_v17 = vrot.slane %v31_v7, %v125_v14  ;;  %v131_v20 = vrot.slane %v31_v7, %v130_v15  ;;  %p194_p11 = por %p193_p10, %p192_p9 }
  0x1a   :  { %v36_v11 = vmul.f32 %v35_v8, %v30_v6  ;;  %p195_p12 = pnand %p194_p11, %p188_p8 }
  0x1c   :  { %v41_v12 = vadd.f32 %v40_v9, %v36_v11 }
  0x1e   :  { %155 = vmatpush3.msra.mxu0 %v41_v12 }
  0x1f   :  { %157 = vmatmul.mubr.msk.f32.vlgmr.msra.gmra.mrb[0].mxu0 %vm49_vm1, %v42_v13 }
  0x94   :  { %v47_v16 = vpop.permute.xlu0 %46 }
  0xf2   :  { %v119_v18 = vpop.f32.mrb[0].mxu0 }
  0xf3   :  { %v120_v19 = vadd.f32 %v119_v18, %v47_v16  ;;  %v158_v21 = vpop.f32.mrb[1].mxu0 }
  0xf5   :  { %v127_v22 = vmul.f32 %v126_v17, %v120_v19 }
  0xf7   :  { %v132_v23 = vadd.f32 %v131_v20, %v127_v22 }
  0xf9   :  { %v133_v24 = vadd.f32 %v132_v23, %v41_v12 }
  0xfb   :  { %135 = vst.msk [vmem:[#allocation5] sm:$0xff] %vm134_vm2, %v133_v24 }
  0xfc   :  { %198 = shalt.err (!%p195_p12)
}
  0xfd   :  { %s199_s8 = scalar_lea.hbm %s280_s4, 128 }
  0xfe   :  { %p200_p13 = scmp.ne.s32.totalorder %s280_s4, %s199_s8  ;;  %p203_p0 = scmp.lt.u32.totalorder %s199_s8, %s280_s4 }
 0x100   :  { %p205_p1 = pnand %p203_p0, %p200_p13 }
 0x102   :  { %208 = shalt.err (!%p205_p1)
}
 0x103   :  { %145 = dma.vmem_to_hbm [thread:$0]  %s143_s3, 128, %s280_s4, [#allocation4]  }
 0x104   :  { %211 = dma.done.wait [#allocation4], 128  }
 0x105   :  { %212 = vsyncadd [#allocation4], 4294967168 }
 0x106   :  { %149 = vsyncpa [#allocation3], 1 }
 0x107   :  { %150 = vsyncpa [#allocation4], 1 }

</bundles_post_ra>
